<compile_context>
chip_gen: v6e
topology: v6e:2x2x1
jax: 0.10.0
libtpu: 0.0.40
codegen_flags: <defaults>
</compile_context>

<pallas_src>
import functools
import math

import numpy as np
import jax
import jax.numpy as jnp
from jax.experimental import pallas as pl
from jax.experimental.pallas import tpu as pltpu

_DEF_BLOCK_BYTES = 6 * 1024 * 1024  # target bytes of predictions per grid block


def _round_up(x, m):
    return ((x + m - 1) // m) * m


def _num_tensorcores():
    """2 on megacore chips (v4 / v5p / v7x), else 1.  Conservative on failure."""
    try:
        kind = jax.devices()[0].device_kind.lower()
    except Exception:
        return 1
    return 2 if any(tag in kind for tag in ("v4", "v5p", "v7")) else 1


def _focal_kernel(preds_ref, sel_ref, alpha_ref, out_ref, acc_ref, *,
                  gamma, tile_m, lanes):
    i = pl.program_id(1)  # row-tile index (reduction axis, innermost)

    @pl.when(i == 0)
    def _init():
        acc_ref[...] = jnp.zeros_like(acc_ref)

    preds = preds_ref[...].astype(jnp.float32)   # (tile_m, L) log-probs (f32 or bf16 in)
    keep = sel_ref[...] != 0                     # int8 one-hot -> bool mask (no f32 cast)

    # Select (NOT multiply) so non-target lanes and padded rows are exactly 0 and any
    # garbage in padded prediction rows cannot propagate.
    logpt = jnp.where(keep, preds, 0.0)
    pt = jnp.exp(logpt)                          # EUP; exp(0) = 1 on masked lanes
    base = jnp.maximum(1.0 - pt, 0.0)            # clamp against pt rounding above 1

    g = float(gamma)
    if g.is_integer() and g >= 0:
        # (1 - pt) ** gamma by squaring: gamma=2 is a single multiply, no transcendentals.
        n = int(g)
        if n == 0:
            w = jnp.ones_like(base)
        else:
            w = None
            sq = base
            while n:
                if n & 1:
                    w = sq if w is None else w * sq
                n >>= 1
                if n:
                    sq = sq * sq
    else:
        w = jnp.where(base > 0.0,
                      jnp.exp(g * jnp.log(jnp.maximum(base, 1e-30))), 0.0)

    # Per-element contribution (<= 0 on target lanes, exactly 0 elsewhere).  Reduce over
    # sublane groups with pure VPU adds into the small (8, L) accumulator; the cross-lane
    # reduction is deferred to the epilogue.
    contrib = w * (alpha_ref[...] * logpt)
    acc_ref[...] += jnp.sum(contrib.reshape(tile_m // 8, 8, lanes), axis=0)

    @pl.when(i == pl.num_programs(1) - 1)
    def _fini():
        # One cross-lane reduce + one lane-dense (8,128) store per split; negation of the
        # accumulated (alpha * logpt) terms is folded in here.
        out_ref[...] = jnp.broadcast_to(-jnp.sum(acc_ref[...], keepdims=True), (8, 128))


def focal_loss(predictions, labels, utterance_lengths, *, gamma=2.0, alpha=None,
               reduction="mean", block_rows=None):
    """Focal loss over batch-concatenated valid frames (utterance_lengths path).

    predictions: (N, C) log-probabilities, N == sum(utterance_lengths)  (f32 or bf16)
    labels:      (B, T, C) one-hot scores (argmax is taken, as in the torch module)
    utterance_lengths: (B,) int
    """
    predictions = jnp.asarray(predictions)
    labels = jnp.asarray(labels)
    lengths = jnp.asarray(utterance_lengths, jnp.int32)

    N, C = predictions.shape
    B, T, C2 = labels.shape
    assert C2 == C, "labels last dim must match predictions classes"

    # --- per-class alpha (same semantics as the torch module) -------------------
    if alpha is None:
        alpha_vec = jnp.ones((C,), jnp.float32)
    elif isinstance(alpha, float):
        alpha_vec = jnp.array([alpha, 1.0 - alpha], jnp.float32)
    else:
        alpha_vec = jnp.asarray(alpha, dtype=jnp.float32)
    if alpha_vec.shape[0] < C:
        # torch would raise at alpha.gather(0, labels); raise eagerly instead.
        raise ValueError(f"alpha has {alpha_vec.shape[0]} entries but C={C}")
    alpha_vec = alpha_vec[:C]

    # --- lane-dense packing: fold k frames so L = k*C is a multiple of 128 ------
    k = 128 // math.gcd(C, 128)          # L = lcm(C, 128) -> always lane-dense
    L = k * C
    m_pack = pl.cdiv(N, k)               # packed rows actually containing data

    # --- block sizing (byte budget, multiple of 32 sublanes for the int8 stream) -
    itemsize = predictions.dtype.itemsize
    if block_rows is None:
        tile_m = _DEF_BLOCK_BYTES // (L * itemsize)
    else:
        tile_m = int(block_rows)
    tile_m = max(32, (tile_m // 32) * 32)
    tile_m = min(tile_m, _round_up(m_pack, 32))
    grid_tiles = pl.cdiv(m_pack, tile_m)

    # 2-TC split only where it helps (megacore chips); ceil-divided so odd tile counts
    # still use both cores - padded rows (all-zero one-hot) cover the tail.
    n_split = 2 if (_num_tensorcores() >= 2 and grid_tiles >= 2) else 1
    tiles_per_split = pl.cdiv(grid_tiles, n_split)
    rows_total = n_split * tiles_per_split * tile_m   # packed rows incl. padding
    rows_flat = rows_total * k                        # frame rows incl. padding

    # --- predictions: zero-copy reshape when aligned, else one pad ---------------
    if rows_flat == N:
        preds_packed = predictions.reshape(rows_total, L)
    else:
        # TODO(synk): this pad is one extra HBM pass over predictions; arrange
        # sum(lengths) % (k * tile_m) == 0 upstream to keep the reshape zero-copy.
        preds_packed = jnp.pad(predictions,
                               ((0, rows_flat - N), (0, 0))).reshape(rows_total, L)

    # --- labels: gather-based ragged compaction (no scatter) ---------------------
    # For each packed destination frame r: find its utterance via searchsorted over
    # cumsum(lengths), gather its argmax class, and build an int8 one-hot whose
    # all-zero rows double as the validity mask for padded frames.
    cls_flat = jnp.argmax(labels.reshape(B * T, C), axis=-1).astype(jnp.int32)
    cum = jnp.cumsum(lengths)                        # (B,)
    total_frames = cum[B - 1]
    r = jnp.arange(rows_flat, dtype=jnp.int32)
    b_idx = jnp.minimum(jnp.searchsorted(cum, r, side="right").astype(jnp.int32), B - 1)
    prev = jnp.where(b_idx > 0, jnp.take(cum, jnp.maximum(b_idx - 1, 0)), 0)
    src = jnp.clip(b_idx * T + (r - prev), 0, B * T - 1)
    cls_rows = jnp.where(r < total_frames, jnp.take(cls_flat, src), -1)   # -1 = padding
    sel_packed = (cls_rows[:, None] == jnp.arange(C, dtype=jnp.int32)[None, :]
                  ).astype(jnp.int8).reshape(rows_total, L)

    alpha_lane = jnp.tile(alpha_vec, k).reshape(1, L)   # alpha[lane % C]

    # --- VMEM budget (generation-aware cap) --------------------------------------
    footprint = (2 * tile_m * L * itemsize      # double-buffered predictions
                 + 2 * tile_m * L               # double-buffered int8 one-hot
                 + 8 * L * 4 + 8 * 128 * 4 + 2 * L * 4)
    try:
        phys_vmem = int(getattr(pltpu.get_tpu_info(), "vmem_capacity_bytes", 64 << 20))
    except Exception:
        phys_vmem = 64 << 20
    vmem_limit = int(min(max(footprint + (8 << 20), 32 << 20), phys_vmem * 3 // 4))

    kernel = functools.partial(_focal_kernel, gamma=float(gamma), tile_m=tile_m, lanes=L)
    row_map = lambda p, i: (p * tiles_per_split + i, 0)

    # TODO(synk): on v7x, pltpu.CORE_PARALLEL on the split axis may beat plain
    # "parallel"; kept "parallel" here as the portable megacore mechanism.
    out = pl.pallas_call(
        kernel,
        out_shape=jax.ShapeDtypeStruct((8 * n_split, 128), jnp.float32),
        grid_spec=pltpu.PrefetchScalarGridSpec(
            num_scalar_prefetch=0,
            grid=(n_split, tiles_per_split),
            in_specs=[
                pl.BlockSpec((tile_m, L), row_map),        # packed predictions
                pl.BlockSpec((tile_m, L), row_map),        # packed int8 one-hot labels
                pl.BlockSpec((1, L), lambda p, i: (0, 0)),  # per-lane alpha (resident)
            ],
            out_specs=pl.BlockSpec((8, 128), lambda p, i: (p, 0)),
            scratch_shapes=[pltpu.VMEM((8, L), jnp.float32)],
        ),
        compiler_params=pltpu.CompilerParams(
            dimension_semantics=("parallel", "arbitrary"),
            vmem_limit_bytes=vmem_limit),
    )(preds_packed, sel_packed, alpha_lane)

    total = jnp.sum(out[0::8, 0])   # one replicated partial sum per split

    if reduction == "mean":
        return total / jnp.sum(lengths).astype(jnp.float32)
    elif reduction == "sum":
        return total
    else:
        raise ValueError(f"unsupported reduction: {reduction}")


def _reference(predictions, labels, lengths, gamma, alpha, reduction):
    """Pure-numpy mirror of the PyTorch forward (utterance_lengths path)."""
    predictions = np.asarray(predictions, np.float64)
    labels = np.asarray(labels)
    lengths = np.asarray(lengths)
    N = predictions.shape[0]
    lab_idx = np.argmax(labels, axis=-1)
    lf = np.concatenate([lab_idx[b, : int(lengths[b])] for b in range(labels.shape[0])])
    logpt = predictions[np.arange(N), lf]
    pt = np.exp(logpt)
    if alpha is None:
        av = np.ones_like(logpt)
    elif isinstance(alpha, float):
        av = np.array([alpha, 1.0 - alpha], np.float64)[lf]
    else:
        av = np.asarray(alpha, np.float64)[lf]
    loss = -1.0 * (1.0 - pt) ** gamma * (logpt * av)
    return float(loss.mean() if reduction == "mean" else loss.sum())


if __name__ == "__main__":
    root = jax.random.PRNGKey(0)

    # (name, B, T, lengths, C, gamma, alpha, reduction, block_rows, dtype)
    cases = [
        # single-tile path, list alpha, mean, integer gamma
        ("small_mean", 2, 40, [40, 24], 4, 2.0, [0.25, 0.75, 0.5, 0.6], "mean", None,
         jnp.float32),
        # tiny ragged input, alpha=None, non-integer gamma, sum
        ("ragged_sum", 2, 8, [6, 4], 4, 1.5, None, "sum", None, jnp.float32),
        # multi-tile grid (+ 2-TC split on megacore chips), float alpha, mean
        ("multi_tile", 2, 3600, [3600, 3440], 2, 2.0, 0.3, "mean", 32, jnp.float32),
        # C that does not divide 128 (L = 384) + bf16 predictions
        ("odd_classes_bf16", 2, 48, [48, 33], 3, 2.0, [0.2, 0.3, 0.5], "mean", None,
         jnp.bfloat16),
    ]

    keys = jax.random.split(root, len(cases))
    for key, (name, B, T, lens, C, gamma, alpha, reduction, block_rows, dtype) in zip(
            keys, cases):
        lens = np.asarray(lens, np.int32)
        N = int(lens.sum())
        k1, k2 = jax.random.split(key)
        logits = jax.random.normal(k1, (N, C), dtype=jnp.float32)
        preds = jax.nn.log_softmax(logits, axis=-1).astype(dtype)   # (N, C) log-probs
        cls = jax.random.randint(k2, (B, T), 0, C)
        labels = jax.nn.one_hot(cls, C, dtype=jnp.float32)          # (B, T, C)

        fn = jax.jit(functools.partial(focal_loss, gamma=gamma, alpha=alpha,
                                       reduction=reduction, block_rows=block_rows))
        got = jax.block_until_ready(fn(preds, labels, jnp.asarray(lens)))
        # Reference sees the same (possibly bf16-rounded) log-probs in float64.
        want = _reference(np.asarray(preds.astype(jnp.float32)), np.asarray(labels),
                          lens, gamma, alpha, reduction)
        assert np.allclose(float(got), want, rtol=1e-4, atol=1e-5), (name, float(got), want)

    print("KERNEL_OK")
</pallas_src>

<mosaic_0001>
module attributes {stable_mosaic.version = 11 : i64} {
  func.func @_focal_kernel(%arg0: i32, %arg1: i32, %arg2: memref<32x128xf32, #tpu.memory_space<vmem>>, %arg3: memref<32x128xi8, #tpu.memory_space<vmem>>, %arg4: memref<1x128xf32, #tpu.memory_space<vmem>>, %arg5: memref<8x128xf32, #tpu.memory_space<vmem>>, %arg6: memref<8x128xf32, #tpu.memory_space<vmem>>) attributes {dimension_semantics = [#tpu.dimension_semantics<parallel>, #tpu.dimension_semantics<arbitrary>], iteration_bounds = array<i64: 1, 1>, scalar_prefetch = 0 : i64, scratch_operands = 1 : i64, tpu.core_type = #tpu.core_type<tc>, window_params = [{transform_indices = @transform_0, window_bounds = array<i64: 32, 128>}, {transform_indices = @transform_1, window_bounds = array<i64: 32, 128>}, {pipeline_mode = #tpu.pipeline_mode<synchronous>, transform_indices = @transform_2, window_bounds = array<i64: 1, 128>}, {transform_indices = @transform_3, window_bounds = array<i64: 8, 128>}]} {
    %c0_i32 = arith.constant 0 : i32
    %0 = arith.cmpi eq, %arg1, %c0_i32 : i32
    %1 = arith.extui %0 : i1 to i32
    %c0_i32_0 = arith.constant 0 : i32
    %2 = arith.cmpi ne, %1, %c0_i32_0 : i32
    scf.if %2 {
      %cst_15 = arith.constant 0.000000e+00 : f32
      %27 = vector.broadcast %cst_15 : f32 to vector<8x128xf32>
      %c0_16 = arith.constant 0 : index
      %c0_17 = arith.constant 0 : index
      %28 = vector.load %arg6[%c0_16, %c0_17] : memref<8x128xf32, #tpu.memory_space<vmem>>, vector<8x128xf32>
      tpu.vector_store %arg6[%c0_16, %c0_17], %27 {strides = array<i32>} : memref<8x128xf32, #tpu.memory_space<vmem>>, vector<8x128xf32>,
    } else {
    }
    %c0 = arith.constant 0 : index
    %c0_1 = arith.constant 0 : index
    %3 = vector.load %arg2[%c0, %c0_1] : memref<32x128xf32, #tpu.memory_space<vmem>>, vector<32x128xf32>
    %c0_2 = arith.constant 0 : index
    %c0_3 = arith.constant 0 : index
    %4 = vector.load %arg3[%c0_2, %c0_3] : memref<32x128xi8, #tpu.memory_space<vmem>>, vector<32x128xi8>
    %c0_i8 = arith.constant 0 : i8
    %5 = vector.broadcast %c0_i8 : i8 to vector<32x128xi8>
    %6 = arith.cmpi ne, %4, %5 : vector<32x128xi8>
    %cst = arith.constant 0.000000e+00 : f32
    %7 = vector.broadcast %cst : f32 to vector<32x128xf32>
    %8 = arith.select %6, %3, %7 : vector<32x128xi1>, vector<32x128xf32>
    %9 = math.exp %8 : vector<32x128xf32>
    %cst_4 = arith.constant 1.000000e+00 : f32
    %10 = vector.broadcast %cst_4 : f32 to vector<32x128xf32>
    %11 = arith.subf %10, %9 : vector<32x128xf32>
    %cst_5 = arith.constant 0.000000e+00 : f32
    %12 = vector.broadcast %cst_5 : f32 to vector<32x128xf32>
    %13 = arith.maximumf %11, %12 : vector<32x128xf32>
    %14 = arith.mulf %13, %13 : vector<32x128xf32>
    %c0_6 = arith.constant 0 : index
    %c0_7 = arith.constant 0 : index
    %15 = vector.load %arg4[%c0_6, %c0_7] : memref<1x128xf32, #tpu.memory_space<vmem>>, vector<1x128xf32>
    %16 = vector.broadcast %15 : vector<1x128xf32> to vector<32x128xf32>
    %17 = arith.mulf %16, %8 : vector<32x128xf32>
    %18 = arith.mulf %14, %17 : vector<32x128xf32>
    %c0_8 = arith.constant 0 : index
    %c0_9 = arith.constant 0 : index
    %19 = vector.load %arg6[%c0_8, %c0_9] : memref<8x128xf32, #tpu.memory_space<vmem>>, vector<8x128xf32>
    %20 = vector.shape_cast %18 : vector<32x128xf32> to vector<4x8x128xf32>
    %cst_10 = arith.constant dense<0.000000e+00> : vector<8x128xf32>
    %21 = vector.multi_reduction <add>, %20, %cst_10 [0] : vector<4x8x128xf32> to vector<8x128xf32>
    %22 = arith.addf %19, %21 : vector<8x128xf32>
    %c0_11 = arith.constant 0 : index
    %c0_12 = arith.constant 0 : index
    %23 = vector.load %arg6[%c0_11, %c0_12] : memref<8x128xf32, #tpu.memory_space<vmem>>, vector<8x128xf32>
    tpu.vector_store %arg6[%c0_11, %c0_12], %22 {strides = array<i32>} : memref<8x128xf32, #tpu.memory_space<vmem>>, vector<8x128xf32>,
    %c0_i32_13 = arith.constant 0 : i32
    %24 = arith.cmpi eq, %arg1, %c0_i32_13 : i32
    %25 = arith.extui %24 : i1 to i32
    %c0_i32_14 = arith.constant 0 : i32
    %26 = arith.cmpi ne, %25, %c0_i32_14 : i32
    scf.if %26 {
      %c0_15 = arith.constant 0 : index
      %c0_16 = arith.constant 0 : index
      %27 = vector.load %arg6[%c0_15, %c0_16] : memref<8x128xf32, #tpu.memory_space<vmem>>, vector<8x128xf32>
      %28 = vector.shape_cast %27 : vector<8x128xf32> to vector<1x8x128xf32>
      %cst_17 = arith.constant dense<0.000000e+00> : vector<1xf32>
      %29 = vector.multi_reduction <add>, %28, %cst_17 [1, 2] : vector<1x8x128xf32> to vector<1xf32>
      %30 = vector.shape_cast %29 : vector<1xf32> to vector<1x1x1xf32>
      %31 = vector.extract %30[0, 0, 0] : f32 from vector<1x1x1xf32>
      %32 = vector.broadcast %31 : f32 to vector<1x1xf32>
      %cst_18 = arith.constant 0.000000e+00 : f32
      %33 = vector.broadcast %cst_18 : f32 to vector<1x1xf32>
      %34 = arith.subf %33, %32 : vector<1x1xf32>
      %35 = vector.shape_cast %34 : vector<1x1xf32> to vector<1x1xf32>
      %36 = vector.broadcast %35 : vector<1x1xf32> to vector<8x128xf32>
      %c0_19 = arith.constant 0 : index
      %c0_20 = arith.constant 0 : index
      %37 = vector.load %arg5[%c0_19, %c0_20] : memref<8x128xf32, #tpu.memory_space<vmem>>, vector<8x128xf32>
      tpu.vector_store %arg5[%c0_19, %c0_20], %36 {strides = array<i32>} : memref<8x128xf32, #tpu.memory_space<vmem>>, vector<8x128xf32>,
    } else {
    }
    return
  }
  func.func @transform_0(%arg0: i32, %arg1: i32) -> (i32, i32) {
    %c1_i32 = arith.constant 1 : i32
    %0 = arith.muli %arg0, %c1_i32 : i32
    %1 = arith.addi %0, %arg1 : i32
    %c0_i32 = arith.constant 0 : i32
    %c0_i32_0 = arith.constant 0 : i32
    return %1, %c0_i32 : i32, i32
  }
  func.func @transform_1(%arg0: i32, %arg1: i32) -> (i32, i32) {
    %c1_i32 = arith.constant 1 : i32
    %0 = arith.muli %arg0, %c1_i32 : i32
    %1 = arith.addi %0, %arg1 : i32
    %c0_i32 = arith.constant 0 : i32
    %c0_i32_0 = arith.constant 0 : i32
    return %1, %c0_i32 : i32, i32
  }
  func.func @transform_2(%arg0: i32, %arg1: i32) -> (i32, i32) {
    %c0_i32 = arith.constant 0 : i32
    %c0_i32_0 = arith.constant 0 : i32
    %c0_i32_1 = arith.constant 0 : i32
    return %c0_i32, %c0_i32_0 : i32, i32
  }
  func.func @transform_3(%arg0: i32, %arg1: i32) -> (i32, i32) {
    %c0_i32 = arith.constant 0 : i32
    %c0_i32_0 = arith.constant 0 : i32
    return %arg0, %c0_i32 : i32, i32
  }
}

</mosaic_0001>

<bundles_post_ra>
// kernel: custom-call
= control target key start
LH: loop header
LB: loop body
LE: loop exit
PB: predicated region body
PF: predicated region fallthrough
CT: control target
= control target key end

     0   :  { %s6_s0 = inlined_call_operand.vmem [shape: u32[1024], index: 0, kind: output, shape index: {}]  }

// kernel: tile.6
= control target key start
LH: loop header
LB: loop body
LE: loop exit
PB: predicated region body
PF: predicated region fallthrough
CT: control target
= control target key end

     0   :  { %s40_s0 = inlined_call_operand.vmem [shape: f32[4], index: 0, kind: input, shape index: {}]   ;;  %s41_s1 = inlined_call_operand.vmem [shape: f32[32,4], index: 1, kind: output, shape index: {}]  }
   0x1   :  { %v4_v0 = vld [vmem:[%s40_s0] ss:$0 sm:$0xff] }
   0x2   :  { %5 = vst [vmem:[%s41_s1] sm:$0xff] %v4_v0  ;;  %12 = vst [vmem:[%s41_s1 + $0x8] sm:$0xff] %v4_v0 }
   0x3   :  { %13 = vst [vmem:[%s41_s1 + $0x10] sm:$0xff] %v4_v0  ;;  %14 = vst [vmem:[%s41_s1 + $0x18] sm:$0xff] %v4_v0 }

// kernel: tile.7
= control target key start
LH: loop header
LB: loop body
LE: loop exit
PB: predicated region body
PF: predicated region fallthrough
CT: control target
= control target key end

     0   :  { %s261_s10 = smov 124   ;;  %s262_s11 = smov 116   ;;  %vm3_vm0 = vcmask 31744   ;;  %vm9_vm1 = vcmask 1048544   ;;  %vm15_vm2 = vcmask 1015744   ;;  %vm21_vm3 = vcmask 982944   ;;  %s401_s0 = inlined_call_operand.vmem [shape: f32[32,4], index: 0, kind: input, shape index: {}]   ;;  %s402_s1 = inlined_call_operand.vmem [shape: f32[1,128], index: 1, kind: output, shape index: {}]  }
   0x1   :  { %v199_v0 = vld [vmem:[%s401_s0 + $0x1f] sm:$0x1]   ;;  %v201_v1 = vld [vmem:[%s401_s0 + $0x1d] sm:$0x1]   ;;  %v200_v2 = vld [vmem:[%s401_s0 + $0x1e] sm:$0x1]  }
   0x2   :  { %7 = vrot.lane.b32.xlu0 %v199_v0, %s261_s10  ;;  %19 = vrot.lane.b32.xlu1 %v201_v1, %s262_s11  ;;  %v202_v3 = vld [vmem:[%s401_s0 + $0x1c] sm:$0x1]   ;;  %s263_s16 = smov 120   ;;  %s264_s17 = smov 112   ;;  %v203_v4 = vld [vmem:[%s401_s0 + $0x1b] sm:$0x1]  }
   0x3   :  { %v204_v5 = vld [vmem:[%s401_s0 + $0x1a] sm:$0x1]   ;;  %s265_s22 = smov 108   ;;  %s266_s23 = smov 104   ;;  %v205_v6 = vld [vmem:[%s401_s0 + $0x19] sm:$0x1]  }
   0x4   :  { %v206_v7 = vld [vmem:[%s401_s0 + $0x18] sm:$0x1]   ;;  %s267_s28 = smov 100   ;;  %s268_s29 = smov 96   ;;  %v207_v8 = vld [vmem:[%s401_s0 + $0x17] sm:$0x1]  }
   0x5   :  { %v208_v9 = vld [vmem:[%s401_s0 + $0x16] sm:$0x1]   ;;  %v2_v10 = vld [vmem:[%s401_s0] sm:$0x1]   ;;  %s269_s7 = smov 92   ;;  %s270_s8 = smov 88  }
   0x6   :  { %13 = vrot.lane.b32.xlu0 %v200_v2, %s263_s16  ;;  %25 = vrot.lane.b32.xlu1 %v202_v3, %s264_s17  ;;  %4 = vst.msk [vmem:[#allocation0] sm:$0x1] %vm3_vm0, %v2_v10   ;;  %v209_v11 = vld [vmem:[%s401_s0 + $0x15] sm:$0x1]   ;;  %v210_v12 = vld [vmem:[%s401_s0 + $0x14] sm:$0x1]  }
   0x7   :  { %s271_s13 = smov 84   ;;  %s272_s14 = smov 80   ;;  %v211_v13 = vld [vmem:[%s401_s0 + $0x13] sm:$0x1]   ;;  %v212_v14 = vld [vmem:[%s401_s0 + $0x12] sm:$0x1]  }
   0x8   :  { %s273_s19 = smov 76   ;;  %s274_s20 = smov 72   ;;  %v213_v15 = vld [vmem:[%s401_s0 + $0x11] sm:$0x1]   ;;  %v214_v16 = vld [vmem:[%s401_s0 + $0x10] sm:$0x1]  }
   0x9   :  { %s275_s25 = smov 68   ;;  %s276_s26 = smov 64   ;;  %v215_v17 = vld [vmem:[%s401_s0 + $0xf] sm:$0x1]   ;;  %v216_v18 = vld [vmem:[%s401_s0 + $0xe] sm:$0x1]  }
   0xa   :  { %31 = vrot.lane.b32.xlu0 %v203_v4, %s265_s22  ;;  %37 = vrot.lane.b32.xlu1 %v204_v5, %s266_s23  ;;  %s277_s2 = smov 60   ;;  %s278_s3 = smov 56   ;;  %v217_v19 = vld [vmem:[%s401_s0 + $0xd] sm:$0x1]   ;;  %v218_v20 = vld [vmem:[%s401_s0 + $0xc] sm:$0x1]  }
   0xb   :  { %s280_s9 = smov 48   ;;  %v219_v21 = vld [vmem:[%s401_s0 + $0xb] sm:$0x1]   ;;  %v220_v22 = vld [vmem:[%s401_s0 + $0xa] sm:$0x1]   ;;  %s282_s15 = smov 40  }
   0xc   :  { %v221_v23 = vld [vmem:[%s401_s0 + $0x9] sm:$0x1]   ;;  %v222_v24 = vld [vmem:[%s401_s0 + $0x8] sm:$0x1]   ;;  %s284_s21 = smov 32   ;;  %s286_s27 = smov 24  }
   0xd   :  { %v223_v25 = vld [vmem:[%s401_s0 + $0x7] sm:$0x1]   ;;  %v224_v26 = vld [vmem:[%s401_s0 + $0x6] sm:$0x1]   ;;  %v225_v27 = vld [vmem:[%s401_s0 + $0x5] sm:$0x1]  }
   0xe   :  { %43 = vrot.lane.b32.xlu0 %v205_v6, %s267_s28  ;;  %49 = vrot.lane.b32.xlu1 %v206_v7, %s268_s29  ;;  %v226_v28 = vld [vmem:[%s401_s0 + $0x4] sm:$0x1]   ;;  %s288_s4 = smov 16   ;;  %v227_v29 = vld [vmem:[%s401_s0 + $0x3] sm:$0x1]   ;;  %s290_s10 = smov 8  }
   0xf   :  { %v228_v30 = vld [vmem:[%s401_s0 + $0x2] sm:$0x1]   ;;  %v229_v31 = vld [vmem:[%s401_s0 + $0x1] sm:$0x1]   ;;  %s291_s0 = smov 4   ;;  %vm27_vm4 = vcmask 950144  }
  0x10   :  { %vm33_vm5 = vcmask 917344   ;;  %vm39_vm6 = vcmask 884544   ;;  %vm45_vm7 = vcmask 851744   ;;  %vm51_vm8 = vcmask 818944  }
  0x11   :  { %vm57_vm9 = vcmask 786144   ;;  %vm63_vm10 = vcmask 753344   ;;  %vm69_vm11 = vcmask 720544   ;;  %vm75_vm12 = vcmask 687744  }
  0x12   :  { %55 = vrot.lane.b32.xlu0 %v207_v8, %s269_s7  ;;  %61 = vrot.lane.b32.xlu1 %v208_v9, %s270_s8  ;;  %s279_s8 = smov 52   ;;  %vm81_vm13 = vcmask 654944   ;;  %vm87_vm14 = vcmask 622144   ;;  %vm93_vm15 = vcmask 589344   ;;  %vm99_vm0 = vcmask 556544  }
  0x16   :  { %67 = vrot.lane.b32.xlu0 %v209_v11, %s271_s13  ;;  %73 = vrot.lane.b32.xlu1 %v210_v12, %s272_s14  ;;  %s281_s14 = smov 44  }
  0x1a   :  { %79 = vrot.lane.b32.xlu0 %v211_v13, %s273_s19  ;;  %85 = vrot.lane.b32.xlu1 %v212_v14, %s274_s20  ;;  %s283_s20 = smov 36  }
  0x1e   :  { %91 = vrot.lane.b32.xlu0 %v213_v15, %s275_s25  ;;  %97 = vrot.lane.b32.xlu1 %v214_v16, %s276_s26  ;;  %s285_s26 = smov 28  }
  0x22   :  { %103 = vrot.lane.b32.xlu0 %v215_v17, %s277_s2  ;;  %109 = vrot.lane.b32.xlu1 %v216_v18, %s278_s3  ;;  %s287_s3 = smov 20  }
  0x26   :  { %115 = vrot.lane.b32.xlu0 %v217_v19, %s279_s8  ;;  %121 = vrot.lane.b32.xlu1 %v218_v20, %s280_s9  ;;  %s289_s9 = smov 12  }
  0x2a   :  { %127 = vrot.lane.b32.xlu0 %v219_v21, %s281_s14  ;;  %133 = vrot.lane.b32.xlu1 %v220_v22, %s282_s15 }
  0x2e   :  { %139 = vrot.lane.b32.xlu0 %v221_v23, %s283_s20  ;;  %145 = vrot.lane.b32.xlu1 %v222_v24, %s284_s21 }
  0x32   :  { %151 = vrot.lane.b32.xlu0 %v223_v25, %s285_s26  ;;  %157 = vrot.lane.b32.xlu1 %v224_v26, %s286_s27 }
  0x36   :  { %163 = vrot.lane.b32.xlu0 %v225_v27, %s287_s3  ;;  %169 = vrot.lane.b32.xlu1 %v226_v28, %s288_s4 }
  0x3a   :  { %175 = vrot.lane.b32.xlu0 %v227_v29, %s289_s9  ;;  %181 = vrot.lane.b32.xlu1 %v228_v30, %s290_s10 }
  0x3e   :  { %187 = vrot.lane.b32.xlu0 %v229_v31, %s291_s0 }
  0x74   :  { %v8_v32 = vpop.permute.xlu0 %7   ;;  %v20_v33 = vpop.permute.xlu1 %19  }
  0x75   :  { %10 = vst.msk [vmem:[#allocation0] sm:$0x1] %vm9_vm1, %v8_v32   ;;  %vm105_vm1 = vcmask 523744  }
  0x78   :  { %v14_v34 = vpop.permute.xlu0 %13   ;;  %v26_v35 = vpop.permute.xlu1 %25  }
  0x79   :  { %16 = vst.msk [vmem:[#allocation0] sm:$0x1] %vm15_vm2, %v14_v34   ;;  %vm111_vm2 = vcmask 490944  }
  0x7a   :  { %22 = vst.msk [vmem:[#allocation0] sm:$0x1] %vm21_vm3, %v20_v33   ;;  %vm117_vm3 = vcmask 458144  }
  0x7b   :  { %28 = vst.msk [vmem:[#allocation0] sm:$0x1] %vm27_vm4, %v26_v35   ;;  %vm123_vm4 = vcmask 425344  }
  0x7c   :  { %v32_v36 = vpop.permute.xlu0 %31   ;;  %v38_v37 = vpop.permute.xlu1 %37  }
  0x7d   :  { %34 = vst.msk [vmem:[#allocation0] sm:$0x1] %vm33_vm5, %v32_v36   ;;  %vm129_vm5 = vcmask 392544  }
  0x7e   :  { %40 = vst.msk [vmem:[#allocation0] sm:$0x1] %vm39_vm6, %v38_v37   ;;  %vm135_vm6 = vcmask 359744  }
  0x80   :  { %v44_v38 = vpop.permute.xlu0 %43   ;;  %v50_v39 = vpop.permute.xlu1 %49  }
  0x81   :  { %46 = vst.msk [vmem:[#allocation0] sm:$0x1] %vm45_vm7, %v44_v38   ;;  %vm141_vm7 = vcmask 326944  }
  0x82   :  { %52 = vst.msk [vmem:[#allocation0] sm:$0x1] %vm51_vm8, %v50_v39   ;;  %vm147_vm8 = vcmask 294144  }
  0x84   :  { %v56_v40 = vpop.permute.xlu0 %55   ;;  %v62_v41 = vpop.permute.xlu1 %61  }
  0x85   :  { %58 = vst.msk [vmem:[#allocation0] sm:$0x1] %vm57_vm9, %v56_v40   ;;  %vm153_vm9 = vcmask 261344  }
  0x86   :  { %64 = vst.msk [vmem:[#allocation0] sm:$0x1] %vm63_vm10, %v62_v41   ;;  %vm159_vm10 = vcmask 228544  }
  0x88   :  { %v68_v42 = vpop.permute.xlu0 %67   ;;  %v74_v43 = vpop.permute.xlu1 %73  }
  0x89   :  { %70 = vst.msk [vmem:[#allocation0] sm:$0x1] %vm69_vm11, %v68_v42   ;;  %vm165_vm11 = vcmask 195744  }
  0x8a   :  { %76 = vst.msk [vmem:[#allocation0] sm:$0x1] %vm75_vm12, %v74_v43   ;;  %vm171_vm12 = vcmask 162944  }
  0x8c   :  { %v80_v44 = vpop.permute.xlu0 %79   ;;  %v86_v45 = vpop.permute.xlu1 %85  }
  0x8d   :  { %82 = vst.msk [vmem:[#allocation0] sm:$0x1] %vm81_vm13, %v80_v44   ;;  %vm177_vm13 = vcmask 130144  }
  0x8e   :  { %88 = vst.msk [vmem:[#allocation0] sm:$0x1] %vm87_vm14, %v86_v45   ;;  %vm183_vm14 = vcmask 97344  }
  0x90   :  { %v92_v46 = vpop.permute.xlu0 %91   ;;  %v98_v47 = vpop.permute.xlu1 %97  }
  0x91   :  { %94 = vst.msk [vmem:[#allocation0] sm:$0x1] %vm93_vm15, %v92_v46   ;;  %vm189_vm15 = vcmask 64544  }
  0x92   :  { %100 = vst.msk [vmem:[#allocation0] sm:$0x1] %vm99_vm0, %v98_v47  }
  0x94   :  { %v104_v48 = vpop.permute.xlu0 %103   ;;  %v110_v49 = vpop.permute.xlu1 %109  }
  0x95   :  { %106 = vst.msk [vmem:[#allocation0] sm:$0x1] %vm105_vm1, %v104_v48  }
  0x96   :  { %112 = vst.msk [vmem:[#allocation0] sm:$0x1] %vm111_vm2, %v110_v49  }
  0x98   :  { %v116_v50 = vpop.permute.xlu0 %115   ;;  %v122_v51 = vpop.permute.xlu1 %121  }
  0x99   :  { %118 = vst.msk [vmem:[#allocation0] sm:$0x1] %vm117_vm3, %v116_v50  }
  0x9a   :  { %124 = vst.msk [vmem:[#allocation0] sm:$0x1] %vm123_vm4, %v122_v51  }
  0x9c   :  { %v128_v52 = vpop.permute.xlu0 %127   ;;  %v134_v53 = vpop.permute.xlu1 %133  }
  0x9d   :  { %130 = vst.msk [vmem:[#allocation0] sm:$0x1] %vm129_vm5, %v128_v52  }
  0x9e   :  { %136 = vst.msk [vmem:[#allocation0] sm:$0x1] %vm135_vm6, %v134_v53  }
  0xa0   :  { %v140_v54 = vpop.permute.xlu0 %139   ;;  %v146_v55 = vpop.permute.xlu1 %145  }
  0xa1   :  { %142 = vst.msk [vmem:[#allocation0] sm:$0x1] %vm141_vm7, %v140_v54  }
  0xa2   :  { %148 = vst.msk [vmem:[#allocation0] sm:$0x1] %vm147_vm8, %v146_v55  }
  0xa4   :  { %v152_v56 = vpop.permute.xlu0 %151   ;;  %v158_v57 = vpop.permute.xlu1 %157  }
  0xa5   :  { %154 = vst.msk [vmem:[#allocation0] sm:$0x1] %vm153_vm9, %v152_v56  }
  0xa6   :  { %160 = vst.msk [vmem:[#allocation0] sm:$0x1] %vm159_vm10, %v158_v57  }
  0xa8   :  { %v164_v58 = vpop.permute.xlu0 %163   ;;  %v170_v59 = vpop.permute.xlu1 %169  }
  0xa9   :  { %166 = vst.msk [vmem:[#allocation0] sm:$0x1] %vm165_vm11, %v164_v58  }
  0xaa   :  { %172 = vst.msk [vmem:[#allocation0] sm:$0x1] %vm171_vm12, %v170_v59  }
  0xac   :  { %v176_v60 = vpop.permute.xlu0 %175   ;;  %v182_v61 = vpop.permute.xlu1 %181  }
  0xad   :  { %178 = vst.msk [vmem:[#allocation0] sm:$0x1] %vm177_vm13, %v176_v60  }
  0xae   :  { %184 = vst.msk [vmem:[#allocation0] sm:$0x1] %vm183_vm14, %v182_v61  }
  0xb0   :  { %v188_v62 = vpop.permute.xlu0 %187  }
  0xb1   :  { %190 = vst.msk [vmem:[#allocation0] sm:$0x1] %vm189_vm15, %v188_v62  }
  0xb8   :  { %v195_v63 = vld [vmem:[#allocation0] sm:$0x1] }
  0xb9   :  { %198 = vst [vmem:[%s402_s1] sm:$0x1] %v195_v63 }

// kernel: focal_loss.1
= control target key start
LH: loop header
LB: loop body
LE: loop exit
PB: predicated region body
PF: predicated region fallthrough
CT: control target
= control target key end

     0   :  { %v184_v1 = vmov 0   ;;  %s226_s1 = inlined_call_operand.vmem [shape: s8[32,128], index: 1, kind: input, shape index: {}]   ;;  %s227_s0 = inlined_call_operand.vmem [shape: f32[32,128], index: 0, kind: input, shape index: {}]   ;;  %s228_s2 = inlined_call_operand.vmem [shape: f32[1,128], index: 2, kind: input, shape index: {}]   ;;  %s229_s3 = inlined_call_operand.vmem [shape: f32[8,128], index: 3, kind: output, shape index: {}]  }
   0x1   :  { %v64_v0 = vld [vmem:[%s226_s1] sm:$0xff]  ;;  %v61_v19 = vld [vmem:[%s227_s0 + $0x8] sm:$0xff]  ;;  %v62_v20 = vld [vmem:[%s227_s0 + $0x10] sm:$0xff] }
   0x2   :  { %vm65_vm0 = vnez %v64_v0  ;;  %v60_v18 = vld [vmem:[%s227_s0] sm:$0xff]  ;;  %v63_v25 = vld [vmem:[%s227_s0 + $0x18] sm:$0xff] }
   0x3   :  { %v66_v2 = vsel %vm65_vm0, 16843009, %v184_v1  ;;  %v172_v36 = vld [vmem:[%s228_s2] ss:$0 sm:$0xff] }
   0x4   :  { %v67_v3 = vunpack.c.0.s8 %v66_v2  ;;  %v68_v4 = vunpack.c.1.s8 %v66_v2  ;;  %v69_v5 = vunpack.c.2.s8 %v66_v2  ;;  %v70_v6 = vunpack.c.3.s8 %v66_v2 }
   0x6   :  { %v71_v7 = vpack.c.b16 %v67_v3, %v67_v3  ;;  %v73_v8 = vpack.c.b16 %v68_v4, %v68_v4  ;;  %v75_v9 = vpack.c.b16 %v69_v5, %v69_v5  ;;  %v77_v10 = vpack.c.b16 %v70_v6, %v70_v6 }
   0x8   :  { %v72_v11 = vpack.c.b8 %v71_v7, %v71_v7  ;;  %v74_v12 = vpack.c.b8 %v73_v8, %v73_v8  ;;  %v76_v13 = vpack.c.b8 %v75_v9, %v75_v9  ;;  %v78_v14 = vpack.c.b8 %v77_v10, %v77_v10 }
   0xa   :  { %vm79_vm1 = vnez %v72_v11  ;;  %vm80_vm2 = vnez %v74_v12  ;;  %vm81_vm3 = vnez %v76_v13  ;;  %vm82_vm4 = vnez %v78_v14 }
   0xb   :  { %v83_v15 = vsel %vm79_vm1, 16843009, %v184_v1  ;;  %v84_v16 = vsel %vm80_vm2, 16843009, %v184_v1  ;;  %v85_v17 = vsel %vm81_vm3, 16843009, %v184_v1 }
   0xc   :  { %v86_v21 = vsel %vm82_vm4, 16843009, %v184_v1  ;;  %v87_v22 = vunpack.c.0.s8 %v83_v15  ;;  %v88_v23 = vunpack.c.0.s8 %v84_v16  ;;  %v89_v24 = vunpack.c.0.s8 %v85_v17 }
   0xd   :  { %v90_v26 = vunpack.c.0.s8 %v86_v21 }
   0xe   :  { %vm91_vm5 = vcmp.ne.s32.totalorder %v87_v22, 0  ;;  %vm92_vm6 = vcmp.ne.s32.totalorder %v88_v23, 0  ;;  %vm93_vm7 = vcmp.ne.s32.totalorder %v89_v24, 0 }
   0xf   :  { %vm94_vm8 = vcmp.ne.s32.totalorder %v90_v26, 0  ;;  %v95_v27 = vsel %vm91_vm5, %v60_v18, 0.0  ;;  %v96_v28 = vsel %vm92_vm6, %v61_v19, 0.0  ;;  %v97_v29 = vsel %vm93_vm7, %v62_v20, 0.0 }
  0x10   :  { %v98_v30 = vsel %vm94_vm8, %v63_v25, 0.0  ;;  %v99_v31 = vmul.f32 1.442695, %v95_v27  ;;  %v101_v32 = vmul.f32 1.442695, %v96_v28  ;;  %v126_v44 = vmul.f32 %v172_v36, %v95_v27 }
  0x11   :  { %v103_v33 = vmul.f32 1.442695, %v97_v29  ;;  %v105_v34 = vmul.f32 1.442695, %v98_v30  ;;  %v127_v47 = vmul.f32 %v172_v36, %v96_v28  ;;  %v128_v50 = vmul.f32 %v172_v36, %v97_v29 }
  0x12   :  { %176 = vpow2.f32 %v99_v31  ;;  %v129_v53 = vmul.f32 %v172_v36, %v98_v30 }
  0x13   :  { %178 = vpow2.f32 %v101_v32 }
  0x14   :  { %180 = vpow2.f32 %v103_v33 }
  0x15   :  { %182 = vpow2.f32 %v105_v34 }
  0x1f   :  { %v177_v35 = vpop.eup %176 }
  0x20   :  { %v179_v37 = vpop.eup %178  ;;  %v107_v38 = vsub.f32 1.0, %v177_v35 }
  0x21   :  { %v181_v39 = vpop.eup %180  ;;  %v108_v40 = vsub.f32 1.0, %v179_v37 }
  0x22   :  { %v183_v41 = vpop.eup %182  ;;  %v109_v42 = vsub.f32 1.0, %v181_v39  ;;  %v111_v43 = vmax.f32 %v107_v38, 0.0 }
  0x23   :  { %v110_v45 = vsub.f32 1.0, %v183_v41  ;;  %v112_v46 = vmax.f32 %v108_v40, 0.0 }
  0x24   :  { %v113_v48 = vmax.f32 %v109_v42, 0.0  ;;  %v115_v49 = vmul.f32 %v111_v43, %v111_v43 }
  0x25   :  { %v114_v51 = vmax.f32 %v110_v45, 0.0  ;;  %v116_v52 = vmul.f32 %v112_v46, %v112_v46 }
  0x26   :  { %v117_v54 = vmul.f32 %v113_v48, %v113_v48  ;;  %v130_v55 = vmul.f32 %v126_v44, %v115_v49 }
  0x27   :  { %v118_v56 = vmul.f32 %v114_v51, %v114_v51  ;;  %v131_v57 = vmul.f32 %v127_v47, %v116_v52 }
  0x28   :  { %v132_v58 = vmul.f32 %v128_v50, %v117_v54 }
  0x29   :  { %v133_v59 = vmul.f32 %v129_v53, %v118_v56  ;;  %v135_v60 = vadd.f32 %v131_v57, %v130_v55 }
  0x2b   :  { %v136_v61 = vadd.f32 %v135_v60, %v132_v58 }
  0x2d   :  { %v137_v62 = vadd.f32 %v136_v61, %v133_v59 }
  0x2f   :  { %144 = vadd.xlane.f32.xlu0 %v137_v62 }
  0xb8   :  { %v145_v63 = vpop.xlane.xlu0 %144 }
  0xb9   :  { %v146_v0 = vrot.slane %v145_v63, 4 }
  0xbb   :  { %v147_v1 = vadd.f32 %v146_v0, %v145_v63 }
  0xbd   :  { %v148_v2 = vrot.slane %v147_v1, 2 }
  0xbf   :  { %v149_v3 = vadd.f32 %v148_v2, %v147_v1 }
  0xc1   :  { %v150_v4 = vrot.slane %v149_v3, 1 }
  0xc3   :  { %v151_v5 = vadd.f32 %v150_v4, %v149_v3 }
  0xc5   :  { %173 = vpush %v151_v5 }
  0xf6   :  { %s174_s2 = spop %173 }
  0xf7   :  { %v153_v6 = vstv %s174_s2 }
  0xf8   :  { %v154_v7 = vsub.f32 0.0, %v153_v6 }
  0xfa   :  { %155 = vst [vmem:[%s229_s3] sm:$0xff] %v154_v7 }

</bundles_post_ra>
